<compile_context>
chip_gen: v7x
topology: tpu7x:2x2x1
jax: 0.10.0
libtpu: 0.0.40
codegen_flags: <defaults>
</compile_context>

<pallas_src>
import math
import functools
import numpy as np
import jax
import jax.numpy as jnp
from jax import lax
from jax.experimental import pallas as pl
from jax.experimental.pallas import tpu as pltpu


def _round_up(a, b):
    return (a + b - 1) // b * b


# ---------------------------------------------------------------------------
# Kernel 1: rayconv   value = src @ W_src + rays * W_ray + b   (bf16 output)
# bf16 MXU operands, f32 accumulation; camera rays applied as 3 rank-1 VPU
# updates (no (C+3)-wide lane operand).
# ---------------------------------------------------------------------------
def _rayconv_kernel(src_ref, ray_ref, w_src_ref, w_ray_ref, b_ref, o_ref):
    v = jnp.dot(src_ref[0], w_src_ref[...],
                preferred_element_type=jnp.float32)          # bf16 x bf16
    ray = ray_ref[0]                                         # (TR, 3) f32
    wr = w_ray_ref[...]                                      # (3, C)  f32
    for k in range(wr.shape[0]):                             # rank-1 updates
        v = v + ray[:, k:k + 1] * wr[k:k + 1, :]
    v = v + b_ref[...]
    # TODO(synk): input_padding_mask (masked_fill of value) not implemented.
    o_ref[0] = v.astype(o_ref.dtype)


# ---------------------------------------------------------------------------
# Kernel 2: reference-point sampling + projective (deformable) attention
# ---------------------------------------------------------------------------
def _projattn_sample_kernel(query_ref, ref_ref, src_ref, value_ref, yx_ref,
                            soaw_w_ref, soaw_b_ref, segsum_ref, out_w_ref,
                            out_b_ref, o_ref, head_acc_ref, *,
                            H, W, Wp, n_heads, n_points, n_levels, d_model):
    M, P, L, C = n_heads, n_points, n_levels, d_model
    dh = C // M
    TQ = query_ref.shape[1]
    vdt = value_ref.dtype                     # bf16

    q = query_ref[0]                          # (TQ, C)        f32
    refp = ref_ref[0]                         # (TQ, 2*L)      f32
    src = src_ref[0]                          # (len_in_p, C)  bf16
    rowflat = yx_ref[0:1, :]                  # (1, len_in_p)  y coord / -1e6
    colflat = yx_ref[1:2, :]                  # (1, len_in_p)  x coord / -1e6

    # --- reference-point feature: grid_sample(src, clamp(2*ref-1)) ---------
    # separable tent weights; out-of-map / padded positions get zero weight
    # (== padding_mode='zeros', align_corners=False).
    gx = jnp.clip(refp[:, 0:1] * 2.0 - 1.0, -1.1, 1.1)
    gy = jnp.clip(refp[:, 1:2] * 2.0 - 1.0, -1.1, 1.1)
    ix = ((gx + 1.0) * W - 1.0) * 0.5
    iy = ((gy + 1.0) * H - 1.0) * 0.5
    ty = jnp.maximum(1.0 - jnp.abs(iy - rowflat), 0.0)        # (TQ, len_in_p)
    tx = jnp.maximum(1.0 - jnp.abs(ix - colflat), 0.0)
    R = (ty * tx).astype(vdt)                                 # once per query
    ref_feat = jnp.dot(R, src, preferred_element_type=jnp.float32)   # (TQ, C)

    feat = ref_feat + q      # stack(ref_feats, 2) + query.unsqueeze(2), L==1

    # --- fused sampling-offset + attention-weight projection (f32: tiny) ---
    soaw = jnp.dot(feat, soaw_w_ref[...],
                   preferred_element_type=jnp.float32) + soaw_b_ref[...]
    so = soaw[:, :M * L * P * 2]                              # (TQ, M*L*P*2)
    aw = soaw[:, M * L * P * 2:]                              # (TQ, M*L*P)

    # hoisted iota constants (JAX does not CSE broadcasts)
    rowv = lax.broadcasted_iota(jnp.int32, (TQ, H), 1).astype(jnp.float32)
    colv = lax.broadcasted_iota(jnp.int32, (TQ, Wp), 1).astype(jnp.float32)

    # --- multi-scale deformable attention aggregation ----------------------
    for h in range(M):
        # per-head softmax over L*P sampling points (approx reciprocal on EUP)
        logits = aw[:, h * L * P:(h + 1) * L * P]
        mx = jnp.max(logits, axis=1, keepdims=True)
        ex = jnp.exp(logits - mx)
        attn = ex * pl.reciprocal(jnp.sum(ex, axis=1, keepdims=True),
                                  approx=True)                # (TQ, L*P)

        v_h = value_ref[0, h, :, :]         # (H, dh*Wp) bf16, lanes = (d, x)

        # Stage 1: row-tent weights for ALL points (attn folded in), stacked
        # along sublanes -> one MXU dot per head (single RHS push of v_h).
        wy_rows = []
        wx_list = []
        for lvl in range(L):                 # L == 1 (asserted)
            rx = refp[:, 2 * lvl:2 * lvl + 1]
            ry = refp[:, 2 * lvl + 1:2 * lvl + 2]
            for p in range(P):
                base = ((h * L + lvl) * P + p) * 2
                px = rx * W + so[:, base:base + 1] - 0.5       # pixel coords
                py = ry * H + so[:, base + 1:base + 2] - 0.5
                wy = jnp.maximum(1.0 - jnp.abs(py - rowv), 0.0)
                wy = wy * attn[:, lvl * P + p:lvl * P + p + 1]
                wx = jnp.maximum(1.0 - jnp.abs(px - colv), 0.0)   # f32
                wy_rows.append(wy.astype(vdt))
                wx_list.append(wx)
        WY = jnp.concatenate(wy_rows, axis=0)                  # (L*P*TQ, H)
        T = jnp.dot(WY, v_h,
                    preferred_element_type=jnp.float32)        # (L*P*TQ, dh*Wp)

        # Stage 2: column tents applied via lane-ALIGNED per-d slices (Wp is a
        # multiple of 128) -- no tiled wx array is ever materialized.
        u_rows = []
        for pp in range(L * P):
            t_p = T[pp * TQ:(pp + 1) * TQ]                     # (TQ, dh*Wp)
            wx = wx_list[pp]                                   # (TQ, Wp)
            u_rows.append(jnp.concatenate(
                [(t_p[:, d * Wp:(d + 1) * Wp] * wx).astype(vdt)
                 for d in range(dh)], axis=1))
        U = jnp.concatenate(u_rows, axis=0)                    # (L*P*TQ, dh*Wp)

        # Stage 3: width segment-sum (one bf16 MXU dot per head), then sum the
        # per-point (TQ, dh) blocks -- no full-width accumulator.
        S = jnp.dot(U, segsum_ref[...],
                    preferred_element_type=jnp.float32)        # (L*P*TQ, dh)
        head = S[0:TQ]
        for pp in range(1, L * P):
            head = head + S[pp * TQ:(pp + 1) * TQ]
        head_acc_ref[:, h * dh:(h + 1) * dh] = head

    # output projection (bf16 operands, f32 accumulation)
    final = jnp.dot(head_acc_ref[...].astype(vdt), out_w_ref[...],
                    preferred_element_type=jnp.float32) + out_b_ref[...]
    o_ref[0] = final.astype(o_ref.dtype)


# ---------------------------------------------------------------------------
# Wrapper
# ---------------------------------------------------------------------------
def proj_attn_forward(params, query, reference_points, src_views,
                      camera_ray_embeds, input_spatial_shapes,
                      input_level_start_index, *, n_heads, n_points,
                      mxu_dtype=jnp.bfloat16):
    N, Lq, C = query.shape
    L = len(src_views)
    assert L == 1, "torch ProjAttn's .view() is only valid for n_levels == 1"
    M, P = n_heads, n_points
    dh = C // M
    shapes = [(int(h), int(w)) for h, w in np.asarray(input_spatial_shapes)]
    starts = [int(s) for s in np.asarray(input_level_start_index)]
    H, W = shapes[0]
    len_in = H * W
    assert sum(h * w for h, w in shapes) == len_in and starts[0] == 0
    assert params['rc_w'].shape[0] == C + 3     # 'use_rayconv' mode

    # ---- generation-aware VMEM budget (leave 25% headroom) -----------------
    try:
        vmem_cap = int(pltpu.get_tpu_info().vmem_capacity_bytes)
    except Exception:
        vmem_cap = 64 * 2**20                   # conservative (v7x-sized)
    vmem_budget = vmem_cap * 3 // 4

    # ---- tiles & padding (sublane/lane-dense blocks, no divisor hunting) ---
    tq_cap = 256 if vmem_cap >= 96 * 2**20 else 128
    TQ = min(tq_cap, _round_up(Lq, 8))
    Lq_pad = _round_up(Lq, TQ)
    Wp = _round_up(W, 128)                      # lane-aligned per-d slices
    TR = min(256, _round_up(len_in, 8))
    len_in_pad = _round_up(len_in, TR)

    # ---- layout glue (XLA): NCHW -> token-major, cast to bf16 ONCE ---------
    src_flat = src_views[0].reshape(N, C, len_in).transpose(0, 2, 1)
    src_bf = src_flat.astype(mxu_dtype)         # reused by both kernels
    rays_flat = camera_ray_embeds[0].reshape(N, len_in, 3)
    if len_in_pad > len_in:
        pad = len_in_pad - len_in
        src_bf = jnp.pad(src_bf, ((0, 0), (0, pad), (0, 0)))
        rays_flat = jnp.pad(rays_flat, ((0, 0), (0, pad), (0, 0)))

    # ---- kernel 1: rayconv value projection (bf16 MXU) ----------------------
    rc_w_src = params['rc_w'][:C].astype(mxu_dtype)   # (C, C)
    rc_w_ray = params['rc_w'][C:]                     # (3, C) f32
    value = pl.pallas_call(
        _rayconv_kernel,
        out_shape=jax.ShapeDtypeStruct((N, len_in_pad, C), mxu_dtype),
        grid=(N, len_in_pad // TR),
        in_specs=[
            pl.BlockSpec((1, TR, C), lambda v, r: (v, r, 0)),
            pl.BlockSpec((1, TR, 3), lambda v, r: (v, r, 0)),
            pl.BlockSpec(rc_w_src.shape, lambda v, r: (0, 0)),
            pl.BlockSpec(rc_w_ray.shape, lambda v, r: (0, 0)),
            pl.BlockSpec(params['rc_b'].shape, lambda v, r: (0, 0)),
        ],
        out_specs=pl.BlockSpec((1, TR, C), lambda v, r: (v, r, 0)),
        compiler_params=pltpu.CompilerParams(
            dimension_semantics=("parallel", "parallel")),
    )(src_bf, rays_flat, rc_w_src, rc_w_ray, params['rc_b'])

    # ---- layout glue: per-head spatial value, lanes = (d, x), width padded --
    # value_c[n, h, y, d*Wp + x] = value[n, y*W + x, h*dh + d]  (0 for x >= W)
    value_sp = value[:, :len_in].reshape(N, H, W, M, dh)
    value_sp = value_sp.transpose(0, 3, 1, 4, 2)          # (N, M, H, dh, W)
    if Wp > W:
        value_sp = jnp.pad(value_sp,
                           ((0, 0), (0, 0), (0, 0), (0, 0), (0, Wp - W)))
    value_c = value_sp.reshape(N, M, H, dh * Wp)

    # ---- constants ----------------------------------------------------------
    yy, xx = np.meshgrid(np.arange(H), np.arange(W), indexing='ij')
    yxa = np.stack([yy.reshape(-1), xx.reshape(-1)]).astype(np.float32)
    if len_in_pad > len_in:
        # padded positions get coordinates far away -> zero tent weight
        yxa = np.concatenate(
            [yxa, np.full((2, len_in_pad - len_in), -1e6, np.float32)], axis=1)
    yx = jnp.asarray(yxa)

    seg = np.zeros((dh * Wp, dh), np.float32)
    for d in range(dh):
        seg[d * Wp:d * Wp + W, d] = 1.0
    segsum = jnp.asarray(seg, mxu_dtype)                  # 0/1 exact in bf16

    soaw_w = jnp.concatenate([params['so_w'], params['aw_w']], axis=1)
    soaw_b = jnp.concatenate([params['so_b'], params['aw_b']], axis=1)
    out_w_bf = params['out_w'].astype(mxu_dtype)

    ref2d = reference_points.reshape(N, Lq, 2 * L)
    query_p = query
    if Lq_pad > Lq:
        query_p = jnp.pad(query, ((0, 0), (0, Lq_pad - Lq), (0, 0)))
        ref2d = jnp.pad(ref2d, ((0, 0), (0, Lq_pad - Lq), (0, 0)))

    # ---- explicit VMEM estimate (double-buffered blocks + temporaries) -----
    def nb(shape, dt):
        return int(np.prod(shape)) * np.dtype(dt).itemsize
    blocks = (nb((1, TQ, C), jnp.float32) + nb((1, TQ, 2 * L), jnp.float32)
              + nb((1, len_in_pad, C), mxu_dtype)
              + nb((1, M, H, dh * Wp), mxu_dtype)
              + nb((1, TQ, C), jnp.float32))
    consts = (nb(yx.shape, jnp.float32) + nb(soaw_w.shape, jnp.float32)
              + nb(segsum.shape, mxu_dtype) + nb(out_w_bf.shape, mxu_dtype))
    temps = (6 * nb((TQ, len_in_pad), jnp.float32)          # ty / tx / R
             + 2 * nb((L * P * TQ, dh * Wp), jnp.float32)   # T (+slack)
             + 2 * nb((L * P * TQ, dh * Wp), mxu_dtype)     # U / WY
             + 4 * nb((TQ, C), jnp.float32))
    est = 2 * (blocks + consts) + temps
    vmem_limit = int(min(max(2 * est, 32 * 2**20), vmem_budget))

    kernel = functools.partial(
        _projattn_sample_kernel, H=H, W=W, Wp=Wp, n_heads=M, n_points=P,
        n_levels=L, d_model=C)

    out = pl.pallas_call(
        kernel,
        out_shape=jax.ShapeDtypeStruct((N, Lq_pad, C), jnp.float32),
        grid=(N, Lq_pad // TQ),
        in_specs=[
            pl.BlockSpec((1, TQ, C), lambda v, t: (v, t, 0)),          # query
            pl.BlockSpec((1, TQ, 2 * L), lambda v, t: (v, t, 0)),      # refpts
            pl.BlockSpec((1, len_in_pad, C), lambda v, t: (v, 0, 0)),  # src
            pl.BlockSpec((1, M, H, dh * Wp), lambda v, t: (v, 0, 0, 0)),  # val
            pl.BlockSpec(yx.shape, lambda v, t: (0, 0)),
            pl.BlockSpec(soaw_w.shape, lambda v, t: (0, 0)),
            pl.BlockSpec(soaw_b.shape, lambda v, t: (0, 0)),
            pl.BlockSpec(segsum.shape, lambda v, t: (0, 0)),
            pl.BlockSpec(out_w_bf.shape, lambda v, t: (0, 0)),
            pl.BlockSpec(params['out_b'].shape, lambda v, t: (0, 0)),
        ],
        out_specs=pl.BlockSpec((1, TQ, C), lambda v, t: (v, t, 0)),
        scratch_shapes=[pltpu.VMEM((TQ, C), jnp.float32)],
        compiler_params=pltpu.CompilerParams(
            dimension_semantics=("parallel", "parallel"),
            vmem_limit_bytes=vmem_limit),
    )(query_p, ref2d, src_bf, value_c, yx, soaw_w, soaw_b, segsum,
      out_w_bf, params['out_b'])
    return out[:, :Lq]


# ---------------------------------------------------------------------------
# Parameter init (deterministic re-implementation of _reset_parameters)
# ---------------------------------------------------------------------------
def init_params(key, d_model, n_heads, n_levels, n_points, mode='use_rayconv'):
    C, M, L, P = d_model, n_heads, n_levels, n_points
    extra = {'use_rayconv': 3, 'use_2d_coordconv': 2,
             'ablation_not_use_rayconv': 0}[mode]
    k1, k2 = jax.random.split(key)

    def xavier(k, fan_in, fan_out):
        bound = math.sqrt(6.0 / (fan_in + fan_out))
        return jax.random.uniform(k, (fan_in, fan_out), jnp.float32,
                                  -bound, bound)

    thetas = np.arange(M, dtype=np.float64) * (2.0 * math.pi / M)
    grid = np.stack([np.cos(thetas), np.sin(thetas)], -1)
    grid = grid / np.abs(grid).max(-1, keepdims=True)
    grid = np.tile(grid.reshape(M, 1, 1, 2), (1, L, P, 1))
    for i in range(P):
        grid[:, :, i, :] *= (i + 1)
    so_b = jnp.asarray(grid.reshape(1, -1), jnp.float32)

    return dict(
        rc_w=xavier(k1, C + extra, C),
        rc_b=jnp.zeros((1, C), jnp.float32),
        so_w=jnp.zeros((C, M * L * P * 2), jnp.float32),
        so_b=so_b,
        aw_w=jnp.zeros((C, M * L * P), jnp.float32),
        aw_b=jnp.zeros((1, M * L * P), jnp.float32),
        out_w=xavier(k2, C, C),
        out_b=jnp.zeros((1, C), jnp.float32),
    )


# ---------------------------------------------------------------------------
# Pure-JAX f32 reference (gather-based) for correctness checking
# ---------------------------------------------------------------------------
def ref_forward(params, query, reference_points, src_views, camera_ray_embeds,
                input_spatial_shapes, input_level_start_index,
                n_heads, n_points):
    N, Lq, C = query.shape
    L = len(src_views)
    M, P = n_heads, n_points
    dh = C // M
    shapes = [(int(h), int(w)) for h, w in np.asarray(input_spatial_shapes)]
    starts = [int(s) for s in np.asarray(input_level_start_index)]

    src_flat = jnp.concatenate(
        [s.reshape(N, C, -1).transpose(0, 2, 1) for s in src_views], axis=1)
    cam_flat = jnp.concatenate(
        [c.reshape(N, -1, c.shape[-1]) for c in camera_ray_embeds], axis=1)
    in_flat = jnp.concatenate([src_flat, cam_flat], axis=-1)
    value = in_flat @ params['rc_w'] + params['rc_b']

    def sample(flat, H, W, start, ix, iy):
        x0 = jnp.floor(ix)
        y0 = jnp.floor(iy)
        out = 0.0
        for dy in (0, 1):
            for dx in (0, 1):
                xc = x0 + dx
                yc = y0 + dy
                w = (1.0 - jnp.abs(ix - xc)) * (1.0 - jnp.abs(iy - yc))
                valid = (xc >= 0) & (xc < W) & (yc >= 0) & (yc < H)
                idx = (start + yc * W + xc).astype(jnp.int32)
                idx = jnp.clip(idx, 0, flat.shape[1] - 1)
                g = jnp.take_along_axis(flat, idx[..., None], axis=1)
                out = out + jnp.where(valid[..., None], w[..., None] * g, 0.0)
        return out

    H0, W0 = shapes[0]
    gx = jnp.clip(reference_points[:, :, 0, 0] * 2 - 1, -1.1, 1.1)
    gy = jnp.clip(reference_points[:, :, 0, 1] * 2 - 1, -1.1, 1.1)
    ref_feat = sample(src_flat, H0, W0, starts[0],
                      ((gx + 1) * W0 - 1) / 2, ((gy + 1) * H0 - 1) / 2)
    feat = ref_feat + query
    so = (feat @ params['so_w'] + params['so_b']).reshape(N, Lq, M, L, P, 2)
    aw = (feat @ params['aw_w'] + params['aw_b']).reshape(N, Lq, M, L * P)
    aw = jax.nn.softmax(aw, axis=-1).reshape(N, Lq, M, L, P)

    out = jnp.zeros((N, Lq, M, dh), jnp.float32)
    for h in range(M):
        acc = jnp.zeros((N, Lq, dh), jnp.float32)
        for l in range(L):
            H, W = shapes[l]
            for p in range(P):
                locx = reference_points[:, :, l, 0] + so[:, :, h, l, p, 0] / W
                locy = reference_points[:, :, l, 1] + so[:, :, h, l, p, 1] / H
                s = sample(value[..., h * dh:(h + 1) * dh], H, W, starts[l],
                           locx * W - 0.5, locy * H - 0.5)
                acc = acc + aw[:, :, h, l, p][..., None] * s
        out = out.at[:, :, h, :].set(acc)
    out = out.reshape(N, Lq, C)
    return out @ params['out_w'] + params['out_b']


if __name__ == "__main__":
    d_model, n_heads, n_levels, n_points = 32, 4, 1, 4
    n_views, len_q, H, W = 2, 8, 16, 16

    key = jax.random.PRNGKey(0)
    kq, kr, ks, kc, kp = jax.random.split(key, 5)

    query = jax.random.normal(kq, (n_views, len_q, d_model), jnp.float32)
    reference_points = jax.random.uniform(
        kr, (n_views, len_q, n_levels, 2), jnp.float32)
    src_views = [jax.random.normal(ks, (n_views, d_model, H, W), jnp.float32)]
    camera_ray_embeds = [jax.random.normal(kc, (n_views, H, W, 3), jnp.float32)]
    input_spatial_shapes = jnp.array([[H, W]], jnp.int32)
    input_level_start_index = jnp.array([0], jnp.int32)

    params = init_params(kp, d_model, n_heads, n_levels, n_points,
                         mode='use_rayconv')

    out = proj_attn_forward(params, query, reference_points, src_views,
                            camera_ray_embeds, input_spatial_shapes,
                            input_level_start_index,
                            n_heads=n_heads, n_points=n_points)
    out = jax.block_until_ready(out)

    ref = ref_forward(params, query, reference_points, src_views,
                      camera_ray_embeds, input_spatial_shapes,
                      input_level_start_index, n_heads, n_points)
    # Tolerance reflects the bf16 MXU operands (src / rayconv weights / value /
    # row tents / segment-sum LHS / head features / output weights); all
    # accumulations, softmax and column tents remain f32.
    np.testing.assert_allclose(np.asarray(out), np.asarray(ref),
                               rtol=3e-2, atol=3e-2)
    print("KERNEL_OK")
</pallas_src>

<mosaic_0001>
module attributes {stable_mosaic.version = 11 : i64} {
  func.func @_rayconv_kernel(%arg0: i32, %arg1: i32, %arg2: memref<1x256x32xbf16, #tpu.memory_space<vmem>>, %arg3: memref<1x256x3xf32, #tpu.memory_space<vmem>>, %arg4: memref<32x32xbf16, #tpu.memory_space<vmem>>, %arg5: memref<3x32xf32, #tpu.memory_space<vmem>>, %arg6: memref<1x32xf32, #tpu.memory_space<vmem>>, %arg7: memref<1x256x32xbf16, #tpu.memory_space<vmem>>) attributes {dimension_semantics = [#tpu.dimension_semantics<parallel>, #tpu.dimension_semantics<parallel>], iteration_bounds = array<i64: 2, 1>, scalar_prefetch = 0 : i64, scratch_operands = 0 : i64, tpu.core_type = #tpu.core_type<tc>, window_params = [{transform_indices = @transform_0, window_bounds = array<i64: 1, 256, 32>}, {transform_indices = @transform_1, window_bounds = array<i64: 1, 256, 3>}, {pipeline_mode = #tpu.pipeline_mode<synchronous>, transform_indices = @transform_2, window_bounds = array<i64: 32, 32>}, {pipeline_mode = #tpu.pipeline_mode<synchronous>, transform_indices = @transform_3, window_bounds = array<i64: 3, 32>}, {pipeline_mode = #tpu.pipeline_mode<synchronous>, transform_indices = @transform_4, window_bounds = array<i64: 1, 32>}, {transform_indices = @transform_5, window_bounds = array<i64: 1, 256, 32>}]} {
    %c0 = arith.constant 0 : index
    %c0_0 = arith.constant 0 : index
    %c0_1 = arith.constant 0 : index
    %0 = vector.load %arg2[%c0, %c0_0, %c0_1] : memref<1x256x32xbf16, #tpu.memory_space<vmem>>, vector<1x256x32xbf16>
    %1 = vector.shape_cast %0 : vector<1x256x32xbf16> to vector<256x32xbf16>
    %c0_2 = arith.constant 0 : index
    %c0_3 = arith.constant 0 : index
    %2 = vector.load %arg4[%c0_2, %c0_3] : memref<32x32xbf16, #tpu.memory_space<vmem>>, vector<32x32xbf16>
    %cst = arith.constant dense<0.000000e+00> : vector<256x32xf32>
    %3 = tpu.matmul %1, %2, %cst {dimension_numbers = #tpu.dot_dimension_numbers<[1], [0], [0], [1], [0, 0, 1, 1], [], []>} : vector<256x32xbf16>, vector<32x32xbf16>, vector<256x32xf32> -> vector<256x32xf32>
    %c0_4 = arith.constant 0 : index
    %c0_5 = arith.constant 0 : index
    %c0_6 = arith.constant 0 : index
    %4 = vector.load %arg3[%c0_4, %c0_5, %c0_6] : memref<1x256x3xf32, #tpu.memory_space<vmem>>, vector<1x256x3xf32>
    %5 = vector.shape_cast %4 : vector<1x256x3xf32> to vector<256x3xf32>
    %c0_7 = arith.constant 0 : index
    %c0_8 = arith.constant 0 : index
    %6 = vector.load %arg5[%c0_7, %c0_8] : memref<3x32xf32, #tpu.memory_space<vmem>>, vector<3x32xf32>
    %7 = vector.extract_strided_slice %5 {offsets = [0, 0], sizes = [256, 1], strides = [1, 1]} : vector<256x3xf32> to vector<256x1xf32>
    %8 = vector.extract_strided_slice %6 {offsets = [0, 0], sizes = [1, 32], strides = [1, 1]} : vector<3x32xf32> to vector<1x32xf32>
    %9 = vector.broadcast %7 : vector<256x1xf32> to vector<256x32xf32>
    %10 = vector.broadcast %8 : vector<1x32xf32> to vector<256x32xf32>
    %11 = arith.mulf %9, %10 : vector<256x32xf32>
    %12 = arith.addf %3, %11 : vector<256x32xf32>
    %13 = vector.extract_strided_slice %5 {offsets = [0, 1], sizes = [256, 1], strides = [1, 1]} : vector<256x3xf32> to vector<256x1xf32>
    %14 = vector.extract_strided_slice %6 {offsets = [1, 0], sizes = [1, 32], strides = [1, 1]} : vector<3x32xf32> to vector<1x32xf32>
    %15 = vector.broadcast %13 : vector<256x1xf32> to vector<256x32xf32>
    %16 = vector.broadcast %14 : vector<1x32xf32> to vector<256x32xf32>
    %17 = arith.mulf %15, %16 : vector<256x32xf32>
    %18 = arith.addf %12, %17 : vector<256x32xf32>
    %19 = vector.extract_strided_slice %5 {offsets = [0, 2], sizes = [256, 1], strides = [1, 1]} : vector<256x3xf32> to vector<256x1xf32>
    %20 = vector.extract_strided_slice %6 {offsets = [2, 0], sizes = [1, 32], strides = [1, 1]} : vector<3x32xf32> to vector<1x32xf32>
    %21 = vector.broadcast %19 : vector<256x1xf32> to vector<256x32xf32>
    %22 = vector.broadcast %20 : vector<1x32xf32> to vector<256x32xf32>
    %23 = arith.mulf %21, %22 : vector<256x32xf32>
    %24 = arith.addf %18, %23 : vector<256x32xf32>
    %c0_9 = arith.constant 0 : index
    %c0_10 = arith.constant 0 : index
    %25 = vector.load %arg6[%c0_9, %c0_10] : memref<1x32xf32, #tpu.memory_space<vmem>>, vector<1x32xf32>
    %26 = vector.broadcast %25 : vector<1x32xf32> to vector<256x32xf32>
    %27 = arith.addf %24, %26 : vector<256x32xf32>
    %28 = arith.truncf %27 : vector<256x32xf32> to vector<256x32xbf16>
    %c0_11 = arith.constant 0 : index
    %c0_12 = arith.constant 0 : index
    %c0_13 = arith.constant 0 : index
    %29 = vector.load %arg7[%c0_11, %c0_12, %c0_13] : memref<1x256x32xbf16, #tpu.memory_space<vmem>>, vector<1x256x32xbf16>
    %30 = vector.shape_cast %29 : vector<1x256x32xbf16> to vector<256x32xbf16>
    %31 = vector.shape_cast %28 : vector<256x32xbf16> to vector<1x256x32xbf16>
    tpu.vector_store %arg7[%c0_11, %c0_12, %c0_13], %31 {strides = array<i32>} : memref<1x256x32xbf16, #tpu.memory_space<vmem>>, vector<1x256x32xbf16>,
    return
  }
  func.func @transform_0(%arg0: i32, %arg1: i32) -> (i32, i32, i32) {
    %c0_i32 = arith.constant 0 : i32
    %c0_i32_0 = arith.constant 0 : i32
    return %arg0, %arg1, %c0_i32 : i32, i32, i32
  }
  func.func @transform_1(%arg0: i32, %arg1: i32) -> (i32, i32, i32) {
    %c0_i32 = arith.constant 0 : i32
    %c0_i32_0 = arith.constant 0 : i32
    return %arg0, %arg1, %c0_i32 : i32, i32, i32
  }
  func.func @transform_2(%arg0: i32, %arg1: i32) -> (i32, i32) {
    %c0_i32 = arith.constant 0 : i32
    %c0_i32_0 = arith.constant 0 : i32
    %c0_i32_1 = arith.constant 0 : i32
    return %c0_i32, %c0_i32_0 : i32, i32
  }
  func.func @transform_3(%arg0: i32, %arg1: i32) -> (i32, i32) {
    %c0_i32 = arith.constant 0 : i32
    %c0_i32_0 = arith.constant 0 : i32
    %c0_i32_1 = arith.constant 0 : i32
    return %c0_i32, %c0_i32_0 : i32, i32
  }
  func.func @transform_4(%arg0: i32, %arg1: i32) -> (i32, i32) {
    %c0_i32 = arith.constant 0 : i32
    %c0_i32_0 = arith.constant 0 : i32
    %c0_i32_1 = arith.constant 0 : i32
    return %c0_i32, %c0_i32_0 : i32, i32
  }
  func.func @transform_5(%arg0: i32, %arg1: i32) -> (i32, i32, i32) {
    %c0_i32 = arith.constant 0 : i32
    %c0_i32_0 = arith.constant 0 : i32
    return %arg0, %arg1, %c0_i32 : i32, i32, i32
  }
}

</mosaic_0001>

<bundles_post_ra>
// kernel: tpu_custom_call.1
= control target key start
LH: loop header
LB: loop body
LE: loop exit
PB: predicated region body
PF: predicated region fallthrough
CT: control target
= control target key end

     0   :  { %s1846_s18 = smov 0   ;;  %s1848_s19 = smov 0   ;;  %s2591_s0 = inlined_call_operand.vmem [shape: bf16[2,256,32], index: 0, kind: input, shape index: {}]   ;;  %s2592_s1 = inlined_call_operand.vmem [shape: f32[2,256,3], index: 1, kind: input, shape index: {}]   ;;  %s2593_s2 = inlined_call_operand.vmem [shape: bf16[32,32], index: 2, kind: input, shape index: {}]   ;;  %s2594_s3 = inlined_call_operand.vmem [shape: f32[3,32], index: 3, kind: input, shape index: {}]   ;;  %s2595_s4 = inlined_call_operand.vmem [shape: f32[1,32], index: 4, kind: input, shape index: {}]   ;;  %s2596_s5 = inlined_call_operand.vmem [shape: bf16[2,256,32], index: 5, kind: output, shape index: {}]  }
   0x1   :  { %s1850_s20 = smov 0  }
   0x2 LB: > { %s27_s21 = sadd.s32 1, %s1807_s19  ;;  %p1569_p0 = scmp.ge.s32.totalorder %s1811_s20, 1  ;;  %s1811_s20 = sphi %s1850_s20, %s15_s20   ;;  %s1807_s19 = sphi %s1848_s19, %s2608_s19   ;;  %s1803_s18 = sphi %s1846_s18, %s2607_s18  }
   0x3   : > { %p29_p1 = scmp.ge.s32.totalorder %s27_s21, 2  ;;  %p225_p2 = scmp.lt.s32.totalorder %s1811_s20, 3 }
   0x5   : > { %s2610_s21 = smov (%p29_p1, %s27_s21), 0  ;;  %p226_p3 = pnand %p1569_p0, %p225_p2 }
   0x7   : > { %229 = sbr.rel (%p226_p3) target bundleno = 351 (0x15f), region = 40 }
   0xe   : > { %v1771_v0 = vld [vmem:[%s2593_s2] sm:$0xff]   ;;  %v1813_v1 = vmov 0   ;;  %v1772_v2 = vld [vmem:[%s2593_s2 + $0x8] sm:$0xff]   ;;  %p271_p4 = scmp.lt.s32.totalorder %s1803_s18, 1  ;;  %vm658_vm0 = vcmask 261120   ;;  %v1814_v51 = vmov 1  }
   0xf   : > { %1766 = vset.pattern.permute.xlu1 %v1813_v1  ;;  %1765 = vset.pattern.permute.xlu0 %v1813_v1  ;;  %v1815_v54 = vmov 2   ;;  %vm1427_vm1 = vcmask 257024  }
  0x10   : > { %1698 = vmatprep.subr.bf16.mxu0 %v1771_v0  ;;  %1734 = vmatprep.subr.bf16.mxu1 %v1771_v0  ;;  %s2612_s18 = smov (!%p271_p4, %s1803_s18), 1 }
  0x11   : > { %1699 = vmatpush3.bf16.msra.mxu0 %v1771_v0  ;;  %1736 = vmatpush3.bf16.msra.mxu1 %v1771_v0  ;;  %s1646_s26 = sshll.u32 %s2612_s18, 8  ;;  %s1645_s27 = sshll.u32 %s2612_s18, 7 }
  0x12   : > { %1700 = vmatprep.subr.bf16.mxu0 %v1772_v2  ;;  %1735 = vmatprep.subr.bf16.mxu1 %v1772_v2  ;;  %s1877_s30 = scalar_lea.vmem %s2592_s1, %s1646_s26  ;;  %s1884_s8 = scalar_lea.vmem %s2591_s0, %s1645_s27 }
  0x13   : > { %v1887_v3 = vld [vmem:[%s1877_s30 + $0x10] sm:$0xff]  ;;  %v1890_v4 = vld [vmem:[%s1877_s30] sm:$0xff]  ;;  %v1897_v7 = vld [vmem:[%s1877_s30 + $0x18] sm:$0xff]  ;;  %s2401_s15 = scalar_lea.vmem %s2596_s5, %s1645_s27 }
  0x14   : > { %382 = vperm.xlu1 %1766, %v1887_v3   ;;  %372 = vperm.xlu0 %1765, %v1890_v4   ;;  %v1773_v5 = vld [vmem:[%s1884_s8] sm:$0xff]   ;;  %v1901_v8 = vld [vmem:[%s1877_s30 + $0x8] sm:$0xff]  ;;  %v1777_v13 = vld [vmem:[%s1884_s8 + $0x10] sm:$0xff]  }
  0x15   : > { %1701 = vmatpush3.bf16.msra.mxu0 %v1772_v2  ;;  %1737 = vmatpush3.bf16.msra.mxu1 %v1772_v2  ;;  %v1774_v6 = vld [vmem:[%s1884_s8 + $0x40] sm:$0xff]   ;;  %v1775_v9 = vld [vmem:[%s1884_s8 + $0x8] sm:$0xff]   ;;  %v1778_v14 = vld [vmem:[%s1884_s8 + $0x50] sm:$0xff]  }
  0x16   : > { %1702 = vmatprep.mubr.msk.bf16.mxu0 %vm658_vm0, %v1773_v5  ;;  %1718 = vmatprep.mubr.msk.bf16.mxu1 %vm658_vm0, %v1774_v6  ;;  %v1776_v10 = vld [vmem:[%s1884_s8 + $0x48] sm:$0xff]   ;;  %v1912_v12 = vld [vmem:[%s1877_s30 + $0x20] sm:$0xff]  ;;  %v1922_v15 = vld [vmem:[%s1877_s30 + $0x38] sm:$0xff] }
  0x17   : > { %v1909_v11 = vld [vmem:[%s1877_s30 + $0x28] sm:$0xff]  ;;  %v1926_v16 = vld [vmem:[%s1877_s30 + $0x30] sm:$0xff]  ;;  %v1779_v17 = vld [vmem:[%s1884_s8 + $0x18] sm:$0xff]  }
  0x18   : > { %387 = vperm.xlu1 %1766, %v1897_v7   ;;  %377 = vperm.xlu0 %1765, %v1901_v8   ;;  %v1780_v18 = vld [vmem:[%s1884_s8 + $0x58] sm:$0xff]   ;;  %v1781_v19 = vld [vmem:[%s1884_s8 + $0x20] sm:$0xff]   ;;  %v1934_v20 = vld [vmem:[%s1877_s30 + $0x48] sm:$0xff] }
  0x19   : > { %1703 = vmatmul.mubr.msk.bf16.vlgmr.msra.gmra.mrb[0].mxu0 %vm658_vm0, %v1775_v9  ;;  %1719 = vmatmul.mubr.msk.bf16.vlgmr.msra.gmra.mrb[0].mxu1 %vm658_vm0, %v1776_v10  ;;  %v1782_v21 = vld [vmem:[%s1884_s8 + $0x60] sm:$0xff]   ;;  %v1945_v23 = vld [vmem:[%s1877_s30 + $0x58] sm:$0xff]  ;;  %v1950_v24 = vld [vmem:[%s1877_s30 + $0x50] sm:$0xff] }
  0x1a   : > { %1706 = vmatprep.mubr.msk.bf16.mxu0 %vm658_vm0, %v1777_v13  ;;  %1722 = vmatprep.mubr.msk.bf16.mxu1 %vm658_vm0, %v1778_v14  ;;  %v1939_v22 = vld [vmem:[%s1877_s30 + $0x40] sm:$0xff]  ;;  %v1783_v25 = vld [vmem:[%s1884_s8 + $0x28] sm:$0xff]   ;;  %v1785_v27 = vld [vmem:[%s1884_s8 + $0x30] sm:$0xff]   ;;  %v530_v13 = vlaneseq }
  0x1b   : > { %v1784_v26 = vld [vmem:[%s1884_s8 + $0x68] sm:$0xff]   ;;  %v1786_v28 = vld [vmem:[%s1884_s8 + $0x70] sm:$0xff]   ;;  %v1963_v30 = vld [vmem:[%s1877_s30 + $0x60] sm:$0xff] }
  0x1c   : > { %397 = vperm.xlu1 %1766, %v1909_v11   ;;  %392 = vperm.xlu0 %1765, %v1912_v12   ;;  %v1960_v29 = vld [vmem:[%s1877_s30 + $0x68] sm:$0xff]  ;;  %v1971_v31 = vld [vmem:[%s1877_s30 + $0x78] sm:$0xff]  ;;  %v1974_v32 = vld [vmem:[%s1877_s30 + $0x70] sm:$0xff] }
  0x1d   : > { %v1787_v33 = vld [vmem:[%s1884_s8 + $0x38] sm:$0xff]   ;;  %v1982_v35 = vld [vmem:[%s1877_s30 + $0x88] sm:$0xff]  ;;  %v1985_v36 = vld [vmem:[%s1877_s30 + $0x80] sm:$0xff] }
  0x1e   : > { %v1788_v34 = vld [vmem:[%s1884_s8 + $0x78] sm:$0xff]   ;;  %v1994_v38 = vld [vmem:[%s1877_s30 + $0x90] sm:$0xff]  ;;  %v1999_v39 = vld [vmem:[%s1877_s30 + $0xa8] sm:$0xff] }
  0x1f   : > { %v1991_v37 = vld [vmem:[%s1877_s30 + $0x98] sm:$0xff]  ;;  %v2002_v40 = vld [vmem:[%s1877_s30 + $0xa0] sm:$0xff]  ;;  %v2010_v42 = vld [vmem:[%s1877_s30 + $0xb0] sm:$0xff] }
  0x20   : > { %407 = vperm.xlu1 %1766, %v1922_v15   ;;  %402 = vperm.xlu0 %1765, %v1926_v16   ;;  %v2007_v41 = vld [vmem:[%s1877_s30 + $0xb8] sm:$0xff]  ;;  %v2015_v43 = vld [vmem:[%s1877_s30 + $0xc8] sm:$0xff]  ;;  %v2018_v44 = vld [vmem:[%s1877_s30 + $0xc0] sm:$0xff] }
  0x21   : > { %1707 = vmatmul.mubr.msk.bf16.gmra.mrb[4].mxu0 %vm658_vm0, %v1779_v17  ;;  %1723 = vmatmul.mubr.msk.bf16.gmra.mrb[4].mxu1 %vm658_vm0, %v1780_v18  ;;  %v2023_v45 = vld [vmem:[%s1877_s30 + $0xd8] sm:$0xff]  ;;  %v2026_v46 = vld [vmem:[%s1877_s30 + $0xd0] sm:$0xff]  ;;  %v2031_v47 = vld [vmem:[%s1877_s30 + $0xe8] sm:$0xff] }
  0x22   : > { %1710 = vmatprep.mubr.msk.bf16.mxu0 %vm658_vm0, %v1781_v19  ;;  %1726 = vmatprep.mubr.msk.bf16.mxu1 %vm658_vm0, %v1782_v21  ;;  %v2034_v48 = vld [vmem:[%s1877_s30 + $0xe0] sm:$0xff]  ;;  %v2039_v49 = vld [vmem:[%s1877_s30 + $0xf8] sm:$0xff]  ;;  %v2042_v50 = vld [vmem:[%s1877_s30 + $0xf0] sm:$0xff] }
  0x24   : > { %417 = vperm.xlu1 %1766, %v1934_v20   ;;  %412 = vperm.xlu0 %1765, %v1939_v22  }
  0x28   : > { %427 = vperm.xlu1 %1766, %v1945_v23   ;;  %422 = vperm.xlu0 %1765, %v1950_v24  }
  0x29   : > { %1711 = vmatmul.mubr.msk.bf16.gmra.mrb[8].mxu0 %vm658_vm0, %v1783_v25  ;;  %1727 = vmatmul.mubr.msk.bf16.gmra.mrb[8].mxu1 %vm658_vm0, %v1784_v26 }
  0x2a   : > { %1714 = vmatprep.mubr.msk.bf16.mxu0 %vm658_vm0, %v1785_v27  ;;  %1730 = vmatprep.mubr.msk.bf16.mxu1 %vm658_vm0, %v1786_v28 }
  0x2c   : > { %437 = vperm.xlu1 %1766, %v1960_v29   ;;  %432 = vperm.xlu0 %1765, %v1963_v30  }
  0x30   : > { %447 = vperm.xlu1 %1766, %v1971_v31   ;;  %442 = vperm.xlu0 %1765, %v1974_v32  }
  0x31   : > { %1715 = vmatmul.mubr.msk.bf16.gmra.mrb[12].mxu0 %vm658_vm0, %v1787_v33  ;;  %1731 = vmatmul.mubr.msk.bf16.gmra.mrb[12].mxu1 %vm658_vm0, %v1788_v34 }
  0x34   : > { %457 = vperm.xlu1 %1766, %v1982_v35   ;;  %452 = vperm.xlu0 %1765, %v1985_v36  }
  0x38   : > { %467 = vperm.xlu1 %1766, %v1991_v37   ;;  %462 = vperm.xlu0 %1765, %v1994_v38  }
  0x3c   : > { %477 = vperm.xlu1 %1766, %v1999_v39   ;;  %472 = vperm.xlu0 %1765, %v2002_v40  }
  0x40   : > { %487 = vperm.xlu1 %1766, %v2007_v41   ;;  %482 = vperm.xlu0 %1765, %v2010_v42  }
  0x44   : > { %497 = vperm.xlu1 %1766, %v2015_v43   ;;  %492 = vperm.xlu0 %1765, %v2018_v44  }
  0x48   : > { %507 = vperm.xlu1 %1766, %v2023_v45   ;;  %502 = vperm.xlu0 %1765, %v2026_v46  }
  0x4c   : > { %517 = vperm.xlu1 %1766, %v2031_v47   ;;  %512 = vperm.xlu0 %1765, %v2034_v48  }
  0x50   : > { %527 = vperm.xlu1 %1766, %v2039_v49   ;;  %522 = vperm.xlu0 %1765, %v2042_v50  }
  0x54   : > { %1768 = vset.pattern.permute.xlu1 %v1814_v51  ;;  %1767 = vset.pattern.permute.xlu0 %v1814_v51 }
  0x55   : > { %873 = vperm.xlu1 %1768, %v1901_v8   ;;  %869 = vperm.xlu0 %1767, %v1890_v4  }
  0x59   : > { %877 = vperm.xlu1 %1768, %v1887_v3   ;;  %881 = vperm.xlu0 %1767, %v1897_v7  }
  0x5d   : > { %885 = vperm.xlu1 %1768, %v1912_v12   ;;  %889 = vperm.xlu0 %1767, %v1909_v11  }
  0x61   : > { %893 = vperm.xlu1 %1768, %v1926_v16   ;;  %897 = vperm.xlu0 %1767, %v1922_v15  }
  0x65   : > { %901 = vperm.xlu1 %1768, %v1939_v22   ;;  %905 = vperm.xlu0 %1767, %v1934_v20  }
  0x69   : > { %909 = vperm.xlu1 %1768, %v1950_v24   ;;  %913 = vperm.xlu0 %1767, %v1945_v23  }
  0x6d   : > { %917 = vperm.xlu1 %1768, %v1963_v30   ;;  %921 = vperm.xlu0 %1767, %v1960_v29  }
  0x71   : > { %925 = vperm.xlu1 %1768, %v1974_v32   ;;  %929 = vperm.xlu0 %1767, %v1971_v31  }
  0x75   : > { %933 = vperm.xlu1 %1768, %v1985_v36   ;;  %937 = vperm.xlu0 %1767, %v1982_v35  }
  0x79   : > { %941 = vperm.xlu1 %1768, %v1994_v38   ;;  %945 = vperm.xlu0 %1767, %v1991_v37  }
  0x7d   : > { %949 = vperm.xlu1 %1768, %v2002_v40   ;;  %953 = vperm.xlu0 %1767, %v1999_v39  }
  0x81   : > { %957 = vperm.xlu1 %1768, %v2010_v42   ;;  %961 = vperm.xlu0 %1767, %v2007_v41  }
  0x85   : > { %965 = vperm.xlu1 %1768, %v2018_v44   ;;  %969 = vperm.xlu0 %1767, %v2015_v43  }
  0x89   : > { %973 = vperm.xlu1 %1768, %v2026_v46   ;;  %977 = vperm.xlu0 %1767, %v2023_v45  }
  0x8d   : > { %981 = vperm.xlu1 %1768, %v2034_v48   ;;  %985 = vperm.xlu0 %1767, %v2031_v47  }
  0x91   : > { %989 = vperm.xlu1 %1768, %v2042_v50   ;;  %993 = vperm.xlu0 %1767, %v2039_v49  }
  0x93   : > { %v2078_v52 = vpop.permute.xlu1 %382  ;;  %v2080_v53 = vpop.permute.xlu0 %372 }
  0x95   : > { %1769 = vset.pattern.permute.xlu1 %v1815_v54  ;;  %1770 = vset.pattern.permute.xlu0 %v1815_v54 }
  0x96   : > { %1065 = vperm.xlu1 %1769, %v1890_v4   ;;  %1069 = vperm.xlu0 %1770, %v1901_v8  }
  0x97   : > { %v2084_v55 = vpop.permute.xlu1 %387  ;;  %v2086_v56 = vpop.permute.xlu0 %377 }
  0x9a   : > { %1073 = vperm.xlu1 %1769, %v1887_v3   ;;  %1081 = vperm.xlu0 %1770, %v1912_v12  }
  0x9b   : > { %v2090_v57 = vpop.permute.xlu1 %397  ;;  %v2092_v58 = vpop.permute.xlu0 %392 }
  0x9e   : > { %1077 = vperm.xlu1 %1769, %v1897_v7   ;;  %1089 = vperm.xlu0 %1770, %v1926_v16   ;;  %v2148_v16 = vshrl.u32 %v530_v13, 7 }
  0x9f   : > { %v2096_v59 = vpop.permute.xlu1 %407  ;;  %v2098_v60 = vpop.permute.xlu0 %402 }
  0xa0   : > { %v532_v19 = vsub.s32 0, %v2148_v16 }
  0xa2   : > { %1085 = vperm.xlu1 %1769, %v1909_v11   ;;  %1097 = vperm.xlu0 %1770, %v1939_v22  }
  0xa3   : > { %v2102_v61 = vpop.permute.xlu1 %417  ;;  %v2104_v62 = vpop.permute.xlu0 %412 }
  0xa6   : > { %1093 = vperm.xlu1 %1769, %v1922_v15   ;;  %1105 = vperm.xlu0 %1770, %v1950_v24  }
  0xa7   : > { %v2108_v63 = vpop.permute.xlu1 %427  ;;  %v2110_v0 = vpop.permute.xlu0 %422 }
  0xaa   : > { %1101 = vperm.xlu1 %1769, %v1934_v20   ;;  %1113 = vperm.xlu0 %1770, %v1963_v30   ;;  %v2162_v20 = vld [vmem:[%s2594_s3] sm:$0x7] }
  0xab   : > { %v2114_v1 = vpop.permute.xlu1 %437  ;;  %v2116_v2 = vpop.permute.xlu0 %432 }
  0xae   : > { %1109 = vperm.xlu1 %1769, %v1945_v23   ;;  %1121 = vperm.xlu0 %1770, %v1974_v32   ;;  %v2169_v23 = vrot.slane %v2162_v20, %v532_v19 }
  0xaf   : > { %v2120_v3 = vpop.permute.xlu1 %447  ;;  %v2122_v4 = vpop.permute.xlu0 %442 }
  0xb2   : > { %1117 = vperm.xlu1 %1769, %v1960_v29   ;;  %1129 = vperm.xlu0 %1770, %v1985_v36  }
  0xb3   : > { %v2126_v5 = vpop.permute.xlu1 %457  ;;  %v453_v6 = vpop.permute.xlu0 %452 }
  0xb6   : > { %1125 = vperm.xlu1 %1769, %v1971_v31   ;;  %1137 = vperm.xlu0 %1770, %v1994_v38  }
  0xb7   : > { %v468_v7 = vpop.permute.xlu1 %467  ;;  %v463_v8 = vpop.permute.xlu0 %462 }
  0xba   : > { %1133 = vperm.xlu1 %1769, %v1982_v35   ;;  %1145 = vperm.xlu0 %1770, %v2002_v40   ;;  %v536_v40 = vmul.f32 %v2169_v23, %v2078_v52 }
  0xbb   : > { %v2132_v9 = vpop.permute.xlu1 %477  ;;  %v2134_v10 = vpop.permute.xlu0 %472 }
  0xbe   : > { %1141 = vperm.xlu1 %1769, %v1991_v37   ;;  %1153 = vperm.xlu0 %1770, %v2010_v42  }
  0xbf   : > { %v2138_v11 = vpop.permute.xlu1 %487  ;;  %v2140_v12 = vpop.permute.xlu0 %482 }
  0xc2   : > { %1149 = vperm.xlu1 %1769, %v1999_v39   ;;  %1161 = vperm.xlu0 %1770, %v2018_v44   ;;  %v998_v39 = vsub.s32 1, %v2148_v16  ;;  %v534_v44 = vmul.f32 %v2169_v23, %v2080_v53  ;;  %v535_v53 = vmul.f32 %v2169_v23, %v2086_v56 }
  0xc3   : > { %v2144_v14 = vpop.permute.xlu1 %497  ;;  %v2146_v15 = vpop.permute.xlu0 %492 }
  0xc4   : > { %v2217_v51 = vrot.slane %v2162_v20, %v998_v39 }
  0xc6   : > { %1157 = vperm.xlu1 %1769, %v2007_v41   ;;  %1169 = vperm.xlu0 %1770, %v2026_v46   ;;  %v552_v41 = vmul.f32 %v2169_v23, %v463_v8 }
  0xc7   : > { %v2152_v17 = vpop.permute.xlu1 %507  ;;  %v2154_v18 = vpop.permute.xlu0 %502 }
  0xca   : > { %1165 = vperm.xlu1 %1769, %v2015_v43   ;;  %1177 = vperm.xlu0 %1770, %v2034_v48  }
  0xcb   : > { %v2164_v21 = vpop.permute.xlu1 %517  ;;  %v2166_v22 = vpop.permute.xlu0 %512 }
  0xce   : > { %1173 = vperm.xlu1 %1769, %v2023_v45   ;;  %1185 = vperm.xlu0 %1770, %v2042_v50   ;;  %v550_v45 = vmul.f32 %v2169_v23, %v453_v6  ;;  %v553_v50 = vmul.f32 %v2169_v23, %v468_v7  ;;  %v551_v6 = vmul.f32 %v2169_v23, %v2126_v5 }
  0xcf   : > { %v528_v24 = vpop.permute.xlu1 %527  ;;  %v2173_v25 = vpop.permute.xlu0 %522 }
  0xd0   : > { %v2176_v26 = vmul.f32 %v2169_v23, %v528_v24 }
  0xd2   : > { %1181 = vperm.xlu1 %1769, %v2031_v47  }
  0xd4   : > { %v2179_v27 = vpop.permute.xlu1 %873  ;;  %v2181_v28 = vpop.permute.xlu0 %869 }
  0xd6   : > { %1189 = vperm.xlu1 %1769, %v2039_v49   ;;  %v537_v49 = vmul.f32 %v2169_v23, %v2084_v55 }
  0xd8   : > { %v2184_v29 = vpop.permute.xlu1 %877  ;;  %v882_v30 = vpop.permute.xlu0 %881 }
  0xd9   : > { %v1003_v7 = vmul.f32 %v2217_v51, %v882_v30 }
  0xdc   : > { %v2186_v31 = vpop.permute.xlu1 %885  ;;  %v2188_v32 = vpop.permute.xlu0 %889 }
  0xe0   : > { %v2190_v33 = vpop.permute.xlu1 %893  ;;  %v898_v34 = vpop.permute.xlu0 %897 }
  0xe4   : > { %v2192_v35 = vpop.permute.xlu1 %901  ;;  %v2194_v36 = vpop.permute.xlu0 %905 }
  0xe8   : > { %v2196_v37 = vpop.permute.xlu1 %909  ;;  %v2198_v38 = vpop.permute.xlu0 %913 }
  0xec   : > { %v1704_v42 = vpop.f32.mrb[0].mxu0  ;;  %v2204_v43 = vpop.permute.xlu1 %917 }
  0xed   : > { %2597 = vst [vmem:[#allocation2_spill] sm:$0xff] %v2204_v43  ;;  %v2209_v46 = vadd.f32 %v1704_v42, %v536_v40  ;;  %v1720_v47 = vpop.f32.mrb[0].mxu1  ;;  %v2211_v48 = vpop.permute.xlu0 %921 }
  0xee   : > { %v2219_v52 = vadd.f32 %v1720_v47, %v552_v41  ;;  %v741_v54 = vpop.f32.mrb[1].mxu0  ;;  %v805_v8 = vpop.f32.mrb[1].mxu1 }
  0xef   : > { %v2225_v13 = vadd.f32 %v741_v54, %v534_v44  ;;  %v2227_v19 = vadd.f32 %v805_v8, %v550_v45  ;;  %v1705_v55 = vpop.f32.mrb[2].mxu0  ;;  %v1721_v24 = vpop.f32.mrb[2].mxu1  ;;  %v540_v44 = vmul.f32 %v2169_v23, %v2098_v60  ;;  %v556_v45 = vmul.f32 %v2169_v23, %v2140_v12 }
  0xf0   : > { %2598 = vst [vmem:[#allocation3_spill] sm:$0xff] %v2219_v52  ;;  %v753_v39 = vadd.f32 %v1705_v55, %v537_v49  ;;  %v817_v40 = vadd.f32 %v1721_v24, %v553_v50  ;;  %v744_v41 = vpop.f32.mrb[3].mxu0  ;;  %v808_v42 = vpop.f32.mrb[3].mxu1  ;;  %v538_v49 = vmul.f32 %v2169_v23, %v2092_v58  ;;  %v539_v12 = vmul.f32 %v2169_v23, %v2090_v57 }
  0xf1   : > { %2599 = vst [vmem:[#allocation4_spill] sm:$0xff] %v2227_v19  ;;  %v2230_v47 = vadd.f32 %v744_v41, %v535_v53  ;;  %v809_v52 = vadd.f32 %v808_v42, %v551_v6  ;;  %v2232_v43 = vpop.permute.xlu1 %925  ;;  %v2234_v56 = vpop.permute.xlu0 %929  ;;  %v541_v53 = vmul.f32 %v2169_v23, %v2096_v59  ;;  %v554_v6 = vmul.f32 %v2169_v23, %v2134_v10 }
  0xf2   : > { %v2236_v5 = vadd.f32 %v1003_v7, %v753_v39  ;;  %v557_v58 = vmul.f32 %v2169_v23, %v2138_v11  ;;  %v555_v59 = vmul.f32 %v2169_v23, %v2132_v9  ;;  %v1007_v10 = vmul.f32 %v2217_v51, %v898_v34 }
  0xf3   : > { %v1005_v57 = vmul.f32 %v2217_v51, %v2188_v32  ;;  %v544_v34 = vmul.f32 %v2169_v23, %v2110_v0  ;;  %v560_v32 = vmul.f32 %v2169_v23, %v2154_v18  ;;  %v545_v0 = vmul.f32 %v2169_v23, %v2108_v63 }
  0xf4   : > { %v1708_v30 = vpop.f32.mrb[4].mxu0  ;;  %v1724_v54 = vpop.f32.mrb[4].mxu1  ;;  %v559_v63 = vmul.f32 %v2169_v23, %v2144_v14 }
  0xf5   : > { %v2244_v50 = vadd.f32 %v1708_v30, %v540_v44  ;;  %v2246_v8 = vpop.permute.xlu1 %933  ;;  %v2252_v55 = vadd.f32 %v1724_v54, %v556_v45  ;;  %v938_v60 = vpop.permute.xlu0 %937 }
  0xf6   : > { %2600 = vst [vmem:[#allocation5_spill] sm:$0xff] %v2246_v8  ;;  %v757_v24 = vpop.f32.mrb[5].mxu0  ;;  %v1017_v7 = vmul.f32 %v2217_v51, %v938_v60  ;;  %v821_v41 = vpop.f32.mrb[5].mxu1 }
  0xf7   : > { %2601 = vst [vmem:[#allocation6_spill] sm:$0xff] %v2252_v55  ;;  %v2259_v39 = vadd.f32 %v757_v24, %v538_v49  ;;  %v1709_v42 = vpop.f32.mrb[6].mxu0  ;;  %v2264_v44 = vadd.f32 %v821_v41, %v554_v6  ;;  %v1725_v30 = vpop.f32.mrb[6].mxu1 }
  0xf8   : > { %v769_v45 = vadd.f32 %v1709_v42, %v541_v53  ;;  %v760_v54 = vpop.f32.mrb[7].mxu0  ;;  %v2268_v11 = vadd.f32 %v1017_v7, %v809_v52  ;;  %v833_v60 = vadd.f32 %v1725_v30, %v557_v58  ;;  %v824_v24 = vpop.f32.mrb[7].mxu1 }
  0xf9   : > { %v761_v49 = vadd.f32 %v760_v54, %v539_v12  ;;  %v2270_v55 = vpop.permute.xlu1 %941  ;;  %v825_v9 = vadd.f32 %v824_v24, %v555_v59  ;;  %v946_v8 = vpop.permute.xlu0 %945  ;;  %v542_v12 = vmul.f32 %v2169_v23, %v2104_v62  ;;  %v543_v62 = vmul.f32 %v2169_v23, %v2102_v61 }
  0xfa   : > { %v2272_v19 = vadd.f32 %v1007_v10, %v769_v45  ;;  %v1019_v6 = vmul.f32 %v2217_v51, %v946_v8  ;;  %v558_v8 = vmul.f32 %v2169_v23, %v2146_v15  ;;  %v1011_v15 = vmul.f32 %v2217_v51, %v2198_v38 }
  0xfb   : > { %v2276_v53 = vadd.f32 %v1005_v57, %v761_v49  ;;  %v548_v38 = vmul.f32 %v2169_v23, %v2122_v4  ;;  %v549_v4 = vmul.f32 %v2169_v23, %v2120_v3  ;;  %v1015_v3 = vmul.f32 %v2217_v51, %v2234_v56 }
  0xfc   : > { %v1712_v52 = vpop.f32.mrb[8].mxu0  ;;  %v2283_v58 = vadd.f32 %v1019_v6, %v817_v40  ;;  %v1728_v41 = vpop.f32.mrb[8].mxu1  ;;  %v561_v40 = vmul.f32 %v2169_v23, %v2152_v17  ;;  %v1009_v17 = vmul.f32 %v2217_v51, %v2194_v36  ;;  %v564_v36 = vmul.f32 %v2169_v23, %v2173_v25 }
  0xfd   : > { %v2285_v7 = vadd.f32 %v1712_v52, %v544_v34  ;;  %v2287_v42 = vpop.permute.xlu1 %949  ;;  %v2293_v59 = vadd.f32 %v1728_v41, %v560_v32  ;;  %v954_v18 = vpop.permute.xlu0 %953 }
  0xfe   : > { %v773_v10 = vpop.f32.mrb[9].mxu0  ;;  %v1021_v45 = vmul.f32 %v2217_v51, %v954_v18  ;;  %v837_v54 = vpop.f32.mrb[9].mxu1 }
  0xff   : > { %v2300_v30 = vadd.f32 %v773_v10, %v542_v12  ;;  %v1713_v57 = vpop.f32.mrb[10].mxu0  ;;  %v2306_v49 = vadd.f32 %v837_v54, %v558_v8  ;;  %v1729_v34 = vpop.f32.mrb[10].mxu1 }
 0x100   : > { %v785_v24 = vadd.f32 %v1713_v57, %v545_v0  ;;  %v776_v61 = vpop.f32.mrb[11].mxu0  ;;  %v2310_v6 = vadd.f32 %v1021_v45, %v825_v9  ;;  %v849_v32 = vadd.f32 %v1729_v34, %v561_v40  ;;  %v840_v12 = vpop.f32.mrb[11].mxu1 }
 0x101   : > { %v777_v52 = vadd.f32 %v776_v61, %v543_v62  ;;  %v2312_v41 = vpop.permute.xlu1 %957  ;;  %v841_v14 = vadd.f32 %v840_v12, %v559_v63  ;;  %v962_v10 = vpop.permute.xlu0 %961  ;;  %v546_v62 = vmul.f32 %v2169_v23, %v2116_v2  ;;  %v562_v63 = vmul.f32 %v2169_v23, %v2166_v22 }
 0x102   : > { %v2314_v18 = vadd.f32 %v1011_v15, %v785_v24  ;;  %v1023_v8 = vmul.f32 %v2217_v51, %v962_v10  ;;  %v547_v2 = vmul.f32 %v2169_v23, %v2114_v1  ;;  %v1013_v1 = vmul.f32 %v2217_v51, %v2211_v48 }
 0x103   : > { %v2318_v0 = vadd.f32 %v1009_v17, %v777_v52  ;;  %v563_v52 = vmul.f32 %v2169_v23, %v2164_v21 }
 0x104   : > { %v1716_v9 = vpop.f32.mrb[12].mxu0  ;;  %v2325_v40 = vadd.f32 %v1023_v8, %v833_v60  ;;  %v1732_v54 = vpop.f32.mrb[12].mxu1 }
 0x105   : > { %v2327_v45 = vadd.f32 %v1716_v9, %v548_v38  ;;  %v2329_v57 = vpop.permute.xlu1 %965  ;;  %v2335_v15 = vadd.f32 %v1732_v54, %v564_v36  ;;  %v970_v25 = vpop.permute.xlu0 %969 }
 0x106   : > { %v789_v24 = vpop.f32.mrb[13].mxu0  ;;  %v1025_v60 = vmul.f32 %v2217_v51, %v970_v25  ;;  %v853_v61 = vpop.f32.mrb[13].mxu1 }
 0x107   : > { %v2340_v34 = vadd.f32 %v789_v24, %v546_v62  ;;  %v1717_v17 = vpop.f32.mrb[14].mxu0  ;;  %v2346_v22 = vadd.f32 %v853_v61, %v562_v63  ;;  %v1733_v10 = vpop.f32.mrb[14].mxu1 }
 0x108   : > { %v801_v12 = vadd.f32 %v1717_v17, %v549_v4  ;;  %v792_v38 = vpop.f32.mrb[15].mxu0  ;;  %v2350_v8 = vadd.f32 %v1025_v60, %v841_v14  ;;  %v865_v36 = vadd.f32 %v1733_v10, %v2176_v26  ;;  %v856_v62 = vpop.f32.mrb[15].mxu1  ;;  %v1194_v14 = vsub.s32 2, %v2148_v16 }
 0x109   : > { %v793_v9 = vadd.f32 %v792_v38, %v547_v2  ;;  %v2353_v54 = vpop.permute.xlu1 %973  ;;  %v857_v23 = vadd.f32 %v856_v62, %v563_v52  ;;  %v978_v56 = vpop.permute.xlu0 %977  ;;  %v1004_v62 = vmul.f32 %v2217_v51, %v2186_v31 }
 0x10a   : > { %v2355_v21 = vadd.f32 %v1015_v3, %v801_v12  ;;  %v1027_v4 = vmul.f32 %v2217_v51, %v978_v56  ;;  %v2371_v17 = vrot.slane %v2162_v20, %v1194_v14  ;;  %v1001_v3 = vmul.f32 %v2217_v51, %v2179_v27 }
 0x10b   : > { %v2357_v63 = vadd.f32 %v1013_v1, %v793_v9  ;;  %v2386_v9 = vld [vmem:[%s2595_s4] ss:$0 sm:$0xff]  ;;  %v1002_v27 = vmul.f32 %v2217_v51, %v2184_v29  ;;  %v1036_v29 = vadd.f32 %v1004_v62, %v2259_v39 }
 0x10c   : > { %v2360_v25 = vadd.f32 %v1027_v4, %v849_v32  ;;  %v1000_v32 = vmul.f32 %v2217_v51, %v2181_v28  ;;  %v1033_v20 = vadd.f32 %v1001_v3, %v2230_v47 }
 0x10d   : > { %v2362_v24 = vpop.permute.xlu1 %981  ;;  %v986_v48 = vpop.permute.xlu0 %985  ;;  %v1034_v56 = vadd.f32 %v1002_v27, %v2209_v46  ;;  %v1008_v27 = vmul.f32 %v2217_v51, %v2192_v35 }
 0x10e   : > { %v1029_v26 = vmul.f32 %v2217_v51, %v986_v48  ;;  %v1032_v10 = vadd.f32 %v1000_v32, %v2225_v13 }
 0x110   : > { %v2366_v2 = vadd.f32 %v1029_v26, %v857_v23 }
 0x111   : > { %v2368_v60 = vpop.permute.xlu1 %989  ;;  %v994_v61 = vpop.permute.xlu0 %993 }
 0x112   : > { %v1031_v52 = vmul.f32 %v2217_v51, %v994_v61  ;;  %v1006_v61 = vmul.f32 %v2217_v51, %v2190_v33 }
 0x114   : > { %v2378_v12 = vadd.f32 %v1031_v52, %v865_v36 }
 0x115   : > { %v1066_v16 = vpop.permute.xlu1 %1065  ;;  %v1070_v1 = vpop.permute.xlu0 %1069 }
 0x116   : > { %v1196_v38 = vmul.f32 %v2371_v17, %v1066_v16  ;;  %v1197_v28 = vmul.f32 %v2371_v17, %v1070_v1 }
 0x118   : > { %v1228_v36 = vadd.f32 %v1196_v38, %v1032_v10  ;;  %v1229_v13 = vadd.f32 %v1197_v28, %v1033_v20  ;;  %v1038_v38 = vadd.f32 %v1006_v61, %v2244_v50 }
 0x119   : > { %v1074_v23 = vpop.permute.xlu1 %1073  ;;  %v1082_v48 = vpop.permute.xlu0 %1081 }
 0x11a   : > { %v1267_v47 = vadd.f32 %v2386_v9, %v1228_v36  ;;  %v1198_v4 = vmul.f32 %v2371_v17, %v1074_v23  ;;  %v1268_v31 = vadd.f32 %v2386_v9, %v1229_v13  ;;  %v1200_v46 = vmul.f32 %v2371_v17, %v1082_v48 }
 0x11c   : > { %v1648_v14 = vpack.c.bf16 %v1267_v47, %v1267_v47  ;;  %v1230_v26 = vadd.f32 %v1198_v4, %v1034_v56  ;;  %v1649_v52 = vpack.c.bf16 %v1268_v31, %v1268_v31  ;;  %v1232_v32 = vadd.f32 %v1200_v46, %v1036_v29 }
 0x11d   : > { %v1078_v3 = vpop.permute.xlu1 %1077  ;;  %v1090_v10 = vpop.permute.xlu0 %1089  ;;  %v1040_v47 = vadd.f32 %v1008_v27, %v2300_v30  ;;  %v1010_v29 = vmul.f32 %v2217_v51, %v2196_v37 }
 0x11e   : > { %1428 = vst.msk [vmem:[%s2401_s15] sm:$0xf] %vm1427_vm1, %v1648_v14  ;;  %v1269_v16 = vadd.f32 %v2386_v9, %v1230_v26  ;;  %v1199_v39 = vmul.f32 %v2371_v17, %v1078_v3  ;;  %1429 = vst.msk [vmem:[%s2401_s15 + $0x4] sm:$0xf] %vm1427_vm1, %v1649_v52  ;;  %v1271_v1 = vadd.f32 %v2386_v9, %v1232_v32 }
 0x11f   : > { %v1202_v33 = vmul.f32 %v2371_v17, %v1090_v10  ;;  %v1042_v52 = vadd.f32 %v1010_v29, %v2285_v7 }
 0x120   : > { %v1650_v20 = vpack.c.bf16 %v1269_v16, %v1269_v16  ;;  %v1231_v28 = vadd.f32 %v1199_v39, %v2236_v5  ;;  %v1652_v36 = vpack.c.bf16 %v1271_v1, %v1271_v1  ;;  %v2602_v16 = vld [vmem:[#allocation2_spill] sm:$0xff] }
 0x121   : > { %v1234_v62 = vadd.f32 %v1202_v33, %v1038_v38  ;;  %v1086_v13 = vpop.permute.xlu1 %1085  ;;  %v1098_v56 = vpop.permute.xlu0 %1097  ;;  %v1012_v39 = vmul.f32 %v2217_v51, %v2602_v16 }
 0x122   : > { %1430 = vst.msk [vmem:[%s2401_s15 + $0x8] sm:$0xf] %vm1427_vm1, %v1650_v20  ;;  %v1270_v50 = vadd.f32 %v2386_v9, %v1231_v28  ;;  %v1201_v23 = vmul.f32 %v2371_v17, %v1086_v13  ;;  %1432 = vst.msk [vmem:[%s2401_s15 + $0x10] sm:$0xf] %vm1427_vm1, %v1652_v36  ;;  %v1204_v35 = vmul.f32 %v2371_v17, %v1098_v56 }
 0x123   : > { %v1273_v5 = vadd.f32 %v2386_v9, %v1234_v62  ;;  %v1044_v28 = vadd.f32 %v1012_v39, %v2340_v34  ;;  %v1014_v13 = vmul.f32 %v2217_v51, %v2232_v43 }
 0x124   : > { %v1651_v4 = vpack.c.bf16 %v1270_v50, %v1270_v50  ;;  %v1233_v48 = vadd.f32 %v1201_v23, %v2276_v53  ;;  %v1236_v46 = vadd.f32 %v1204_v35, %v1040_v47  ;;  %v2603_v35 = vld [vmem:[#allocation5_spill] sm:$0xff] }
 0x125   : > { %v1654_v31 = vpack.c.bf16 %v1273_v5, %v1273_v5  ;;  %v1094_v14 = vpop.permute.xlu1 %1093  ;;  %v1106_v61 = vpop.permute.xlu0 %1105 }
 0x126   : > { %1431 = vst.msk [vmem:[%s2401_s15 + $0xc] sm:$0xf] %vm1427_vm1, %v1651_v4  ;;  %v1272_v30 = vadd.f32 %v2386_v9, %v1233_v48  ;;  %v1203_v26 = vmul.f32 %v2371_v17, %v1094_v14  ;;  %v1275_v53 = vadd.f32 %v2386_v9, %v1236_v46  ;;  %v1206_v37 = vmul.f32 %v2371_v17, %v1106_v61 }
 0x127   : > { %1434 = vst.msk [vmem:[%s2401_s15 + $0x18] sm:$0xf] %vm1427_vm1, %v1654_v31  ;;  %v1016_v4 = vmul.f32 %v2217_v51, %v2603_v35 }
 0x128   : > { %v1653_v32 = vpack.c.bf16 %v1272_v30, %v1272_v30  ;;  %v1235_v3 = vadd.f32 %v1203_v26, %v2272_v19  ;;  %v1656_v10 = vpack.c.bf16 %v1275_v53, %v1275_v53  ;;  %v1238_v38 = vadd.f32 %v1206_v37, %v1042_v52  ;;  %v2604_v52 = vld [vmem:[#allocation4_spill] sm:$0xff] }
 0x129   : > { %v1102_v1 = vpop.permute.xlu1 %1101  ;;  %v1114_v20 = vpop.permute.xlu0 %1113  ;;  %v1048_v53 = vadd.f32 %v1016_v4, %v2604_v52  ;;  %v1018_v37 = vmul.f32 %v2217_v51, %v2270_v55 }
 0x12a   : > { %1433 = vst.msk [vmem:[%s2401_s15 + $0x14] sm:$0xf] %vm1427_vm1, %v1653_v32  ;;  %v1274_v7 = vadd.f32 %v2386_v9, %v1235_v3  ;;  %v1205_v33 = vmul.f32 %v2371_v17, %v1102_v1  ;;  %1436 = vst.msk [vmem:[%s2401_s15 + $0x20] sm:$0xf] %vm1427_vm1, %v1656_v10  ;;  %v1277_v19 = vadd.f32 %v2386_v9, %v1238_v38 }
 0x12b   : > { %v1208_v27 = vmul.f32 %v2371_v17, %v1114_v20 }
 0x12c   : > { %v1655_v36 = vpack.c.bf16 %v1274_v7, %v1274_v7  ;;  %v1237_v62 = vadd.f32 %v1205_v33, %v2318_v0  ;;  %v1658_v50 = vpack.c.bf16 %v1277_v19, %v1277_v19  ;;  %v1046_v0 = vadd.f32 %v1014_v13, %v2327_v45  ;;  %v2605_v33 = vld [vmem:[#allocation3_spill] sm:$0xff] }
 0x12d   : > { %v1240_v23 = vadd.f32 %v1208_v27, %v1044_v28  ;;  %v1110_v56 = vpop.permute.xlu1 %1109  ;;  %v1122_v5 = vpop.permute.xlu0 %1121  ;;  %v1050_v20 = vadd.f32 %v1018_v37, %v2605_v33  ;;  %v1020_v28 = vmul.f32 %v2217_v51, %v2287_v42 }
 0x12e   : > { %1435 = vst.msk [vmem:[%s2401_s15 + $0x1c] sm:$0xf] %vm1427_vm1, %v1655_v36  ;;  %v1276_v34 = vadd.f32 %v2386_v9, %v1237_v62  ;;  %v1207_v47 = vmul.f32 %v2371_v17, %v1110_v56  ;;  %1438 = vst.msk [vmem:[%s2401_s15 + $0x28] sm:$0xf] %vm1427_vm1, %v1658_v50  ;;  %v1210_v48 = vmul.f32 %v2371_v17, %v1122_v5 }
 0x12f   : > { %v1279_v43 = vadd.f32 %v2386_v9, %v1240_v23 }
 0x130   : > { %v1657_v29 = vpack.c.bf16 %v1276_v34, %v1276_v34  ;;  %v1239_v31 = vadd.f32 %v1207_v47, %v2314_v18  ;;  %v1242_v14 = vadd.f32 %v1210_v48, %v1046_v0  ;;  %v1052_v34 = vadd.f32 %v1020_v28, %v2264_v44 }
 0x131   : > { %v1660_v46 = vpack.c.bf16 %v1279_v43, %v1279_v43  ;;  %v1118_v30 = vpop.permute.xlu1 %1117  ;;  %v1130_v45 = vpop.permute.xlu0 %1129  ;;  %v1022_v47 = vmul.f32 %v2217_v51, %v2312_v41 }
 0x132   : > { %1437 = vst.msk [vmem:[%s2401_s15 + $0x24] sm:$0xf] %vm1427_vm1, %v1657_v29  ;;  %v1278_v26 = vadd.f32 %v2386_v9, %v1239_v31  ;;  %v1209_v61 = vmul.f32 %v2371_v17, %v1118_v30  ;;  %v1281_v18 = vadd.f32 %v2386_v9, %v1242_v14  ;;  %v1212_v32 = vmul.f32 %v2371_v17, %v1130_v45  ;;  %v2606_v31 = vld [vmem:[#allocation6_spill] sm:$0xff] }
 0x133   : > { %1440 = vst.msk [vmem:[%s2401_s15 + $0x30] sm:$0xf] %vm1427_vm1, %v1660_v46  ;;  %v1054_v46 = vadd.f32 %v1022_v47, %v2606_v31  ;;  %v1024_v14 = vmul.f32 %v2217_v51, %v2329_v57 }
 0x134   : > { %v1659_v3 = vpack.c.bf16 %v1278_v26, %v1278_v26  ;;  %v1241_v16 = vadd.f32 %v1209_v61, %v2357_v63  ;;  %v1662_v39 = vpack.c.bf16 %v1281_v18, %v1281_v18  ;;  %v1244_v10 = vadd.f32 %v1212_v32, %v1048_v53 }
 0x135   : > { %v1126_v38 = vpop.permute.xlu1 %1125  ;;  %v1138_v55 = vpop.permute.xlu0 %1137  ;;  %v1056_v32 = vadd.f32 %v1024_v14, %v2306_v49 }
 0x136   : > { %1439 = vst.msk [vmem:[%s2401_s15 + $0x2c] sm:$0xf] %vm1427_vm1, %v1659_v3  ;;  %v1280_v1 = vadd.f32 %v2386_v9, %v1241_v16  ;;  %v1211_v7 = vmul.f32 %v2371_v17, %v1126_v38  ;;  %1442 = vst.msk [vmem:[%s2401_s15 + $0x38] sm:$0xf] %vm1427_vm1, %v1662_v39  ;;  %v1283_v63 = vadd.f32 %v2386_v9, %v1244_v10 }
 0x137   : > { %v1214_v19 = vmul.f32 %v2371_v17, %v1138_v55  ;;  %v1026_v3 = vmul.f32 %v2217_v51, %v2353_v54 }
 0x138   : > { %v1661_v27 = vpack.c.bf16 %v1280_v1, %v1280_v1  ;;  %v1243_v36 = vadd.f32 %v1211_v7, %v2355_v21  ;;  %v1664_v62 = vpack.c.bf16 %v1283_v63, %v1283_v63 }
 0x139   : > { %v1246_v13 = vadd.f32 %v1214_v19, %v1050_v20  ;;  %v1134_v50 = vpop.permute.xlu1 %1133  ;;  %v1146_v42 = vpop.permute.xlu0 %1145  ;;  %v1058_v33 = vadd.f32 %v1026_v3, %v2293_v59  ;;  %v1028_v20 = vmul.f32 %v2217_v51, %v2362_v24 }
 0x13a   : > { %1441 = vst.msk [vmem:[%s2401_s15 + $0x34] sm:$0xf] %vm1427_vm1, %v1661_v27  ;;  %v1282_v23 = vadd.f32 %v2386_v9, %v1243_v36  ;;  %v1213_v56 = vmul.f32 %v2371_v17, %v1134_v50  ;;  %1444 = vst.msk [vmem:[%s2401_s15 + $0x40] sm:$0xf] %vm1427_vm1, %v1664_v62  ;;  %v1216_v5 = vmul.f32 %v2371_v17, %v1146_v42 }
 0x13b   : > { %v1285_v21 = vadd.f32 %v2386_v9, %v1246_v13  ;;  %v1060_v50 = vadd.f32 %v1028_v20, %v2346_v22 }
 0x13c   : > { %v1663_v35 = vpack.c.bf16 %v1282_v23, %v1282_v23  ;;  %v1245_v4 = vadd.f32 %v1213_v56, %v2268_v11  ;;  %v1248_v43 = vadd.f32 %v1216_v5, %v1052_v34  ;;  %v1030_v23 = vmul.f32 %v2217_v51, %v2368_v60 }
 0x13d   : > { %v1666_v0 = vpack.c.bf16 %v1285_v21, %v1285_v21  ;;  %v1142_v48 = vpop.permute.xlu1 %1141  ;;  %v1154_v41 = vpop.permute.xlu0 %1153 }
 0x13e   : > { %1443 = vst.msk [vmem:[%s2401_s15 + $0x3c] sm:$0xf] %vm1427_vm1, %v1663_v35  ;;  %v1284_v44 = vadd.f32 %v2386_v9, %v1245_v4  ;;  %v1215_v29 = vmul.f32 %v2371_v17, %v1142_v48  ;;  %v1287_v11 = vadd.f32 %v2386_v9, %v1248_v43  ;;  %v1218_v30 = vmul.f32 %v2371_v17, %v1154_v41 }
 0x13f   : > { %1446 = vst.msk [vmem:[%s2401_s15 + $0x48] sm:$0xf] %vm1427_vm1, %v1666_v0  ;;  %v1062_v35 = vadd.f32 %v1030_v23, %v2335_v15 }
 0x140   : > { %v1665_v26 = vpack.c.bf16 %v1284_v44, %v1284_v44  ;;  %v1247_v61 = vadd.f32 %v1215_v29, %v2283_v58  ;;  %v1668_v45 = vpack.c.bf16 %v1287_v11, %v1287_v11  ;;  %v1250_v52 = vadd.f32 %v1218_v30, %v1054_v46 }
 0x141   : > { %v1150_v53 = vpop.permute.xlu1 %1149  ;;  %v1162_v57 = vpop.permute.xlu0 %1161 }
 0x142   : > { %1445 = vst.msk [vmem:[%s2401_s15 + $0x44] sm:$0xf] %vm1427_vm1, %v1665_v26  ;;  %v1286_v37 = vadd.f32 %v2386_v9, %v1247_v61  ;;  %v1217_v18 = vmul.f32 %v2371_v17, %v1150_v53  ;;  %1448 = vst.msk [vmem:[%s2401_s15 + $0x50] sm:$0xf] %vm1427_vm1, %v1668_v45  ;;  %v1289_v58 = vadd.f32 %v2386_v9, %v1250_v52 }
 0x143   : > { %v1220_v16 = vmul.f32 %v2371_v17, %v1162_v57 }
 0x144   : > { %v1667_v39 = vpack.c.bf16 %v1286_v37, %v1286_v37  ;;  %v1249_v10 = vadd.f32 %v1217_v18, %v2310_v6  ;;  %v1670_v38 = vpack.c.bf16 %v1289_v58, %v1289_v58 }
 0x145   : > { %v1252_v1 = vadd.f32 %v1220_v16, %v1056_v32  ;;  %v1158_v7 = vpop.permute.xlu1 %1157  ;;  %v1170_v54 = vpop.permute.xlu0 %1169 }
 0x146   : > { %1447 = vst.msk [vmem:[%s2401_s15 + $0x4c] sm:$0xf] %vm1427_vm1, %v1667_v39  ;;  %v1288_v49 = vadd.f32 %v2386_v9, %v1249_v10  ;;  %v1219_v55 = vmul.f32 %v2371_v17, %v1158_v7  ;;  %1450 = vst.msk [vmem:[%s2401_s15 + $0x58] sm:$0xf] %vm1427_vm1, %v1670_v38  ;;  %v1222_v28 = vmul.f32 %v2371_v17, %v1170_v54 }
 0x147   : > { %v1291_v6 = vadd.f32 %v2386_v9, %v1252_v1 }
 0x148   : > { %v1669_v63 = vpack.c.bf16 %v1288_v49, %v1288_v49  ;;  %v1251_v19 = vadd.f32 %v1219_v55, %v2325_v40  ;;  %v1254_v36 = vadd.f32 %v1222_v28, %v1058_v33 }
 0x149   : > { %v1672_v27 = vpack.c.bf16 %v1291_v6, %v1291_v6  ;;  %v1166_v62 = vpop.permute.xlu1 %1165  ;;  %v1178_v24 = vpop.permute.xlu0 %1177 }
 0x14a   : > { %1449 = vst.msk [vmem:[%s2401_s15 + $0x54] sm:$0xf] %vm1427_vm1, %v1669_v63  ;;  %v1290_v59 = vadd.f32 %v2386_v9, %v1251_v19  ;;  %v1221_v13 = vmul.f32 %v2371_v17, %v1166_v62  ;;  %v1293_v40 = vadd.f32 %v2386_v9, %v1254_v36  ;;  %v1224_v56 = vmul.f32 %v2371_v17, %v1178_v24 }
 0x14b   : > { %1452 = vst.msk [vmem:[%s2401_s15 + $0x60] sm:$0xf] %vm1427_vm1, %v1672_v27 }
 0x14c   : > { %v1671_v42 = vpack.c.bf16 %v1290_v59, %v1290_v59  ;;  %v1253_v34 = vadd.f32 %v1221_v13, %v2350_v8  ;;  %v1674_v47 = vpack.c.bf16 %v1293_v40, %v1293_v40  ;;  %v1256_v21 = vadd.f32 %v1224_v56, %v1060_v50 }
 0x14d   : > { %v1174_v5 = vpop.permute.xlu1 %1173  ;;  %v1186_v60 = vpop.permute.xlu0 %1185 }
 0x14e   : > { %1451 = vst.msk [vmem:[%s2401_s15 + $0x5c] sm:$0xf] %vm1427_vm1, %v1671_v42  ;;  %v1292_v22 = vadd.f32 %v2386_v9, %v1253_v34  ;;  %v1223_v51 = vmul.f32 %v2371_v17, %v1174_v5  ;;  %1454 = vst.msk [vmem:[%s2401_s15 + $0x68] sm:$0xf] %vm1427_vm1, %v1674_v47  ;;  %v1295_v4 = vadd.f32 %v2386_v9, %v1256_v21 }
 0x14f   : > { %v1226_v8 = vmul.f32 %v2371_v17, %v1186_v60 }
 0x150   : > { %v1673_v0 = vpack.c.bf16 %v1292_v22, %v1292_v22  ;;  %v1255_v43 = vadd.f32 %v1223_v51, %v2360_v25  ;;  %v1676_v48 = vpack.c.bf16 %v1295_v4, %v1295_v4 }
 0x151   : > { %v1258_v44 = vadd.f32 %v1226_v8, %v1062_v35  ;;  %v1182_v29 = vpop.permute.xlu1 %1181 }
 0x152   : > { %1453 = vst.msk [vmem:[%s2401_s15 + $0x64] sm:$0xf] %vm1427_vm1, %v1673_v0  ;;  %v1294_v41 = vadd.f32 %v2386_v9, %v1255_v43  ;;  %v1225_v15 = vmul.f32 %v2371_v17, %v1182_v29  ;;  %1456 = vst.msk [vmem:[%s2401_s15 + $0x70] sm:$0xf] %vm1427_vm1, %v1676_v48 }
 0x153   : > { %v1297_v31 = vadd.f32 %v2386_v9, %v1258_v44 }
 0x154   : > { %v1675_v46 = vpack.c.bf16 %v1294_v41, %v1294_v41  ;;  %v1257_v14 = vadd.f32 %v1225_v15, %v2366_v2 }
 0x155   : > { %v1678_v25 = vpack.c.bf16 %v1297_v31, %v1297_v31  ;;  %v1190_v11 = vpop.permute.xlu1 %1189 }
 0x156   : > { %1455 = vst.msk [vmem:[%s2401_s15 + $0x6c] sm:$0xf] %vm1427_vm1, %v1675_v46  ;;  %v1296_v30 = vadd.f32 %v2386_v9, %v1257_v14  ;;  %v1227_v26 = vmul.f32 %v2371_v17, %v1190_v11 }
 0x157   : > { %1458 = vst.msk [vmem:[%s2401_s15 + $0x78] sm:$0xf] %vm1427_vm1, %v1678_v25 }
 0x158   : > { %v1677_v61 = vpack.c.bf16 %v1296_v30, %v1296_v30  ;;  %v1259_v45 = vadd.f32 %v1227_v26, %v2378_v12 }
 0x15a   : > { %1457 = vst.msk [vmem:[%s2401_s15 + $0x74] sm:$0xf] %vm1427_vm1, %v1677_v61  ;;  %v1298_v52 = vadd.f32 %v2386_v9, %v1259_v45 }
 0x15c   : > { %v1679_v53 = vpack.c.bf16 %v1298_v52, %v1298_v52 }
 0x15e   : > { %1459 = vst.msk [vmem:[%s2401_s15 + $0x7c] sm:$0xf] %vm1427_vm1, %v1679_v53 }
 0x15f PF: > { %s15_s20 = sadd.s32 1, %s1811_s20   ;;  %s2607_s18 = smov %s1807_s19 }
 0x160   : > { %p12_p5 = scmp.ge.s32.totalorder %s15_s20, 4   ;;  %s2608_s19 = smov %s2610_s21 }
 0x162   :  { %14 = sbr.rel (!%p12_p5) target bundleno = 2 (0x2), region = 73 }

</bundles_post_ra>
